<compile_context>
chip_gen: v5e
topology: v5e:2x2
jax: 0.10.0
libtpu: 0.0.40
codegen_flags: <defaults>
</compile_context>

<pallas_src>
import math

import jax
import jax.numpy as jnp
from jax.experimental import pallas as pl
from jax.experimental.pallas import tpu as pltpu


def _dyt_fused_gate_kernel(alpha_ref, x_ref, gate_ref, w_ref, o_ref):
    # alpha_ref: SMEM scalar-prefetch, shape (1,)
    # x_ref / gate_ref / o_ref: (row_tile, lane_tile) VMEM tiles
    # w_ref: (1, lane_tile) f32 VMEM tile, broadcast over rows
    alpha = alpha_ref[0]
    xf = x_ref[...].astype(jnp.float32)
    gf = gate_ref[...].astype(jnp.float32)
    y = jnp.tanh(alpha * xf)                      # EUP transcendental, f32
    o_ref[...] = (y * w_ref[...] * gf).astype(o_ref.dtype)


def _cdiv(a, b):
    return -(-a // b)


def _sublane_multiple(dtype):
    bits = jnp.dtype(dtype).itemsize * 8
    if bits >= 32:
        return 8
    if bits == 16:
        return 16
    return 32


def _vmem_capacity_bytes():
    try:
        info = pltpu.get_tpu_info()
        cap = getattr(info, "vmem_capacity_bytes", None)
        if cap:
            return int(cap)
    except Exception:
        pass
    return 64 << 20  # conservative (v7x per-TC) fallback


def dynamic_tanh_fused_gate(x, gate, alpha, weight):
    """out = tanh(alpha * x) * weight * gate.

    x, gate: (..., hidden); alpha: (1,); weight: (hidden,).
    Output dtype follows x.dtype (compute runs in f32).
    """
    assert x.shape == gate.shape
    hidden = x.shape[-1]
    assert weight.shape == (hidden,)

    orig_shape = x.shape
    dtype = x.dtype
    dtype_bytes = jnp.dtype(dtype).itemsize
    total = x.size
    sub = _sublane_multiple(dtype)

    cap = _vmem_capacity_bytes()
    budget = max(cap - (16 << 20), cap // 2)       # ~75% of VMEM usable
    tile_cap_bytes = min(8 << 20, budget // 6)     # 6 live buffers (x,g,o x2)

    # ---- lane-dense last dim, chosen WITHOUT copying the arrays ----
    if hidden % 128 == 0:
        lane = hidden
        w_row = weight
    else:
        lcm = hidden * 128 // math.gcd(hidden, 128)
        if total % lcm == 0 and sub * lcm * dtype_bytes <= tile_cap_bytes:
            lane = lcm                              # exact reshape, unmasked vst
            w_row = jnp.tile(weight, lcm // hidden)
        else:
            lane = hidden                           # masked stores, zero copies
            w_row = weight
            # TODO(synk): for huge non-128-multiple hidden a padded-hidden
            # variant would restore unmasked stores; not needed for typical
            # transformer hidden sizes.

    rows = total // lane
    x2 = x.reshape(rows, lane)
    g2 = gate.reshape(rows, lane)
    w2 = w_row.reshape(1, lane).astype(jnp.float32)

    # ---- lane tiling (only when lane is a 128-multiple and too big) ----
    if lane % 128 == 0 and sub * lane * dtype_bytes > tile_cap_bytes:
        lane_tile = max(128, (tile_cap_bytes // (sub * dtype_bytes)) // 128 * 128)
    else:
        lane_tile = lane

    # ---- row tiling ----
    if rows <= sub:
        row_tile = rows                             # full (squeezed) row dim
    else:
        rt = max(1, tile_cap_bytes // (lane_tile * dtype_bytes))
        if rows >= 2 * sub:
            rt = min(rt, _cdiv(rows, 2))            # >=2 steps -> both v7x TCs
        rt = max(sub, (rt // sub) * sub)
        rt = min(rt, (rows // sub) * sub)
        row_tile = rt

    grid = (_cdiv(rows, row_tile), _cdiv(lane, lane_tile))

    alpha = jnp.asarray(alpha).reshape(-1).astype(jnp.float32)  # (1,), SMEM

    # Cover the double-buffered footprint explicitly (v5e default scoped VMEM
    # limit is only 16 MiB); stay below physical VMEM.
    tile_bytes = row_tile * lane_tile * dtype_bytes
    footprint = 6 * tile_bytes + 2 * lane_tile * 4
    vmem_limit = int(min(cap - (4 << 20),
                         max(footprint + (2 << 20), 32 << 20)))

    cost = pl.CostEstimate(
        flops=3 * total,
        transcendentals=total,
        bytes_accessed=3 * total * dtype_bytes + hidden * 4,
    )

    out = pl.pallas_call(
        _dyt_fused_gate_kernel,
        out_shape=jax.ShapeDtypeStruct((rows, lane), dtype),
        grid_spec=pltpu.PrefetchScalarGridSpec(
            num_scalar_prefetch=1,                                   # alpha
            grid=grid,
            in_specs=[
                pl.BlockSpec((row_tile, lane_tile), lambda i, j, a: (i, j)),  # x
                pl.BlockSpec((row_tile, lane_tile), lambda i, j, a: (i, j)),  # gate
                pl.BlockSpec((1, lane_tile), lambda i, j, a: (0, j)),         # weight
            ],
            out_specs=pl.BlockSpec((row_tile, lane_tile), lambda i, j, a: (i, j)),
        ),
        compiler_params=pltpu.CompilerParams(
            dimension_semantics=("parallel", "parallel"),   # shard across v7x TCs
            vmem_limit_bytes=vmem_limit,
        ),
        cost_estimate=cost,
    )(alpha, x2, g2, w2)

    return out.reshape(orig_shape)


if __name__ == "__main__":
    batch, seq, hidden = 2, 8, 32
    normalized_shape = hidden
    alpha_init_value = 0.5

    key = jax.random.PRNGKey(0)
    kx, kg = jax.random.split(key)
    x = jax.random.normal(kx, (batch, seq, hidden), dtype=jnp.float32)
    gate = jax.random.normal(kg, (batch, seq, hidden), dtype=jnp.float32)

    # Deterministic parameter init (matches module __init__ / _init_weights).
    alpha = jnp.ones((1,), dtype=jnp.float32) * alpha_init_value
    weight = jnp.ones((normalized_shape,), dtype=jnp.float32)

    out = dynamic_tanh_fused_gate(x, gate, alpha, weight)
    out = jax.block_until_ready(out)

    # Reference check in plain JAX.
    ref = jnp.tanh(alpha[0] * x) * weight * gate
    assert out.shape == x.shape
    assert jnp.allclose(out, ref, atol=1e-6, rtol=1e-6)

    print("KERNEL_OK")
</pallas_src>

<mosaic_0001>
module attributes {stable_mosaic.version = 11 : i64} {
  func.func @_dyt_fused_gate_kernel(%arg0: i32, %arg1: i32, %arg2: memref<1xf32, #tpu.memory_space<smem>>, %arg3: memref<4x128xf32, #tpu.memory_space<vmem>>, %arg4: memref<4x128xf32, #tpu.memory_space<vmem>>, %arg5: memref<1x128xf32, #tpu.memory_space<vmem>>, %arg6: memref<4x128xf32, #tpu.memory_space<vmem>>) attributes {dimension_semantics = [#tpu.dimension_semantics<parallel>, #tpu.dimension_semantics<parallel>], iteration_bounds = array<i64: 1, 1>, scalar_prefetch = 1 : i64, scratch_operands = 0 : i64, tpu.core_type = #tpu.core_type<tc>, window_params = [{transform_indices = @transform_0, window_bounds = array<i64: 4, 128>}, {transform_indices = @transform_1, window_bounds = array<i64: 4, 128>}, {transform_indices = @transform_2, window_bounds = array<i64: 1, 128>}, {transform_indices = @transform_3, window_bounds = array<i64: 4, 128>}]} {
    %c0 = arith.constant 0 : index
    %0 = memref.load %arg2[%c0] : memref<1xf32, #tpu.memory_space<smem>>
    %c0_0 = arith.constant 0 : index
    %c0_1 = arith.constant 0 : index
    %1 = vector.load %arg3[%c0_0, %c0_1] : memref<4x128xf32, #tpu.memory_space<vmem>>, vector<4x128xf32>
    %c0_2 = arith.constant 0 : index
    %c0_3 = arith.constant 0 : index
    %2 = vector.load %arg4[%c0_2, %c0_3] : memref<4x128xf32, #tpu.memory_space<vmem>>, vector<4x128xf32>
    %3 = vector.broadcast %0 : f32 to vector<4x128xf32>
    %4 = arith.mulf %3, %1 : vector<4x128xf32>
    %5 = math.tanh %4 : vector<4x128xf32>
    %c0_4 = arith.constant 0 : index
    %c0_5 = arith.constant 0 : index
    %6 = vector.load %arg5[%c0_4, %c0_5] : memref<1x128xf32, #tpu.memory_space<vmem>>, vector<1x128xf32>
    %7 = vector.broadcast %6 : vector<1x128xf32> to vector<4x128xf32>
    %8 = arith.mulf %5, %7 : vector<4x128xf32>
    %9 = arith.mulf %8, %2 : vector<4x128xf32>
    %c0_6 = arith.constant 0 : index
    %c0_7 = arith.constant 0 : index
    %10 = vector.load %arg6[%c0_6, %c0_7] : memref<4x128xf32, #tpu.memory_space<vmem>>, vector<4x128xf32>
    tpu.vector_store %arg6[%c0_6, %c0_7], %9 {strides = array<i32>} : memref<4x128xf32, #tpu.memory_space<vmem>>, vector<4x128xf32>,
    return
  }
  func.func @transform_0(%arg0: i32, %arg1: i32, %arg2: memref<1xf32, #tpu.memory_space<smem>>) -> (i32, i32) {
    %c0_i32 = arith.constant 0 : i32
    return %arg0, %arg1 : i32, i32
  }
  func.func @transform_1(%arg0: i32, %arg1: i32, %arg2: memref<1xf32, #tpu.memory_space<smem>>) -> (i32, i32) {
    %c0_i32 = arith.constant 0 : i32
    return %arg0, %arg1 : i32, i32
  }
  func.func @transform_2(%arg0: i32, %arg1: i32, %arg2: memref<1xf32, #tpu.memory_space<smem>>) -> (i32, i32) {
    %c0_i32 = arith.constant 0 : i32
    %c0_i32_0 = arith.constant 0 : i32
    return %c0_i32, %arg1 : i32, i32
  }
  func.func @transform_3(%arg0: i32, %arg1: i32, %arg2: memref<1xf32, #tpu.memory_space<smem>>) -> (i32, i32) {
    %c0_i32 = arith.constant 0 : i32
    return %arg0, %arg1 : i32, i32
  }
}

</mosaic_0001>

<bundles_post_ra>
// kernel: tpu_custom_call.1
= control target key start
LH: loop header
LB: loop body
LE: loop exit
PB: predicated region body
PF: predicated region fallthrough
CT: control target
= control target key end

     0   :  { %10 = vsyncpa [#allocation5], 0  ;;  %s203_s0 = inlined_call_operand.<no memory space> [shape: f32[1], index: 0, kind: input, shape index: {}]   ;;  %s204_s1 = inlined_call_operand.hbm [shape: f32[4,128], index: 1, kind: input, shape index: {}]   ;;  %s205_s2 = inlined_call_operand.hbm [shape: f32[4,128], index: 2, kind: input, shape index: {}]   ;;  %s206_s3 = inlined_call_operand.vmem [shape: f32[1,128], index: 3, kind: input, shape index: {}]   ;;  %s207_s4 = inlined_call_operand.hbm [shape: f32[4,128], index: 4, kind: output, shape index: {}]  }
   0x1   :  { %11 = vsyncpa [#allocation8], 0 }
   0x2   :  { %12 = vsyncpa [#allocation6], 0  ;;  %s18_s17 = sshll.u32 %s204_s1, 4  ;;  %s160_s18 = smov [#allocation4]   ;;  %s19_s17 = int_to_ptr.hbm [resolvable:$true] %s18_s17 }
   0x3   :  { %s20_s19 = sshll.u32 %s160_s18, 4  ;;  %s29_s22 = sshll.u32 %s205_s2, 4  ;;  %s21_s19 = int_to_ptr.vmem [resolvable:$true] %s20_s19  ;;  %s30_s22 = int_to_ptr.hbm [resolvable:$true] %s29_s22 }
   0x4   :  { %23 = dma.hbm_to_vmem [thread:$0]  %s19_s17, 64, %s21_s19, [#allocation5]  }
   0x5   :  { %s161_s23 = smov [#allocation7]  }
   0x6   :  { %s31_s24 = sshll.u32 %s161_s23, 4  ;;  %s32_s24 = int_to_ptr.vmem [resolvable:$true] %s31_s24 }
   0x7   :  { %34 = dma.hbm_to_vmem [thread:$0]  %s30_s22, 64, %s32_s24, [#allocation8]  }
   0x8   :  { %154 = dma.done.wait [#allocation5], 64  }
   0x9   :  { %155 = vsyncadd [#allocation5], 4294967232 }
   0xa   :  { %156 = dma.done.wait [#allocation8], 64  }
   0xb   :  { %157 = vsyncadd [#allocation8], 4294967232  ;;  %v48_v0 = vstv %s203_s0  ;;  %v46_v1 = vld [vmem:[#allocation4] sm:$0xf]  ;;  %v47_v5 = vld [vmem:[#allocation7] sm:$0xf] }
   0xc   :  { %v49_v2 = vmul.f32 %v48_v0, %v46_v1  ;;  %v79_v3 = vld [vmem:[%s206_s3] ss:$0 sm:$0xff]  ;;  %s162_s2 = smov [#allocation9]   ;;  %s65_s5 = sshll.u32 %s207_s4, 4  ;;  %s66_s5 = int_to_ptr.hbm [resolvable:$true] %s65_s5 }
   0xd   :  { %s63_s28 = sshll.u32 %s162_s2, 4  ;;  %s64_s28 = int_to_ptr.vmem [resolvable:$true] %s63_s28 }
   0xe   :  { %80 = vtanh.f32 %v49_v2 }
  0x14   :  { %v81_v4 = vpop.eup %80 }
  0x15   :  { %v55_v6 = vmul.f32 %v81_v4, %v79_v3 }
  0x17   :  { %v56_v7 = vmul.f32 %v55_v6, %v47_v5 }
  0x19   :  { %57 = vst [vmem:[#allocation9] sm:$0xf] %v56_v7 }
  0x1a   :  { %68 = dma.vmem_to_hbm [thread:$0]  %s64_s28, 64, %s66_s5, [#allocation6]  }
  0x1b   :  { %158 = dma.done.wait [#allocation6], 64  }
  0x1c   :  { %159 = vsyncadd [#allocation6], 4294967232 }
  0x1d   :  { %73 = vsyncpa [#allocation5], 1 }
  0x1e   :  { %74 = vsyncpa [#allocation8], 1 }
  0x1f   :  { %75 = vsyncpa [#allocation6], 1 }

</bundles_post_ra>
